<compile_context>
chip_gen: v6e
topology: v6e:2x2x1
jax: 0.10.0
libtpu: 0.0.40
codegen_flags: <defaults>
</compile_context>

<pallas_src>
import functools
import math

import jax
import jax.numpy as jnp
from jax.experimental import pallas as pl
from jax.experimental.pallas import tpu as pltpu

LANE = 128
SUBLANE = 8


def _round_up(x, m):
    return (x + m - 1) // m * m


# ----------------------- capability probe (eager, once) ----------------------

@functools.lru_cache(maxsize=1)
def _single_buffer_supported():
    """Probe (eagerly, outside jit) whether this jax/libtpu build supports
    pl.Buffered(1) single-buffering for grid-resident pallas_call operands."""
    def k(x_ref, w_ref, o_ref):
        o_ref[...] = x_ref[...] + w_ref[...]

    try:
        f = pl.pallas_call(
            k,
            out_shape=jax.ShapeDtypeStruct((2 * SUBLANE, LANE), jnp.float32),
            grid=(2,),
            in_specs=[
                pl.BlockSpec((SUBLANE, LANE), lambda i: (i, 0)),
                pl.BlockSpec((SUBLANE, LANE), lambda i: (0, 0),
                             pipeline_mode=pl.Buffered(1)),
            ],
            out_specs=pl.BlockSpec((SUBLANE, LANE), lambda i: (i, 0)),
        )
        x = jnp.arange(2 * SUBLANE * LANE, dtype=jnp.float32)
        x = x.reshape(2 * SUBLANE, LANE)
        w = jnp.ones((SUBLANE, LANE), jnp.float32)
        y = jax.block_until_ready(f(x, w))
        return bool(jnp.allclose(y, x + 1.0))
    except Exception:  # unsupported on this build -> default double-buffering
        return False


# ----------------------------- Pallas kernel --------------------------------

def _make_discriminator_kernel(num_layers, activation, lrelu_val, lhs_dtype):
    """Fused MLP kernel.

    Refs (in order): x (tm, P_in0), w_0..w_{L-1} (P_in_i, P_out_i),
                     b_0..b_{L-1} (1, P_out_i), out (tm, P_out_{L-1}).
    Layer L-1 is the fused [src | cls] head (no activation).

    Zero padding is self-consistent: padded weight rows/cols and padded bias
    lanes are 0 and act(0) == 0 for the supported activations, so padded lanes
    never contaminate real output lanes.
    """
    if activation not in ("", "relu", "lrelu"):
        raise ValueError(
            "zero-padding invariant requires act(0) == 0; got activation=%r"
            % (activation,))
    # max(h, a*h) == LeakyReLU(a) only for 0 <= a <= 1.
    lrelu_max_form = 0.0 <= float(lrelu_val) <= 1.0
    cast_lhs = jnp.dtype(lhs_dtype) != jnp.dtype(jnp.float32)

    def kernel(*refs):
        x_ref = refs[0]
        w_refs = refs[1:1 + num_layers]
        b_refs = refs[1 + num_layers:1 + 2 * num_layers]
        out_ref = refs[-1]

        h = x_ref[...]
        for i in range(num_layers):
            lhs = h.astype(lhs_dtype) if cast_lhs else h
            h = jnp.dot(lhs, w_refs[i][...],
                        preferred_element_type=jnp.float32) + b_refs[i][...]
            if i < num_layers - 1:   # fused head has no activation
                if activation == "relu":
                    h = jnp.maximum(h, 0.0)
                elif activation == "lrelu":
                    if lrelu_max_form:
                        h = jnp.maximum(h, lrelu_val * h)
                    else:
                        h = jnp.where(h >= 0.0, h, lrelu_val * h)
        out_ref[...] = h.astype(out_ref.dtype)

    return kernel


# ------------------------- one-time parameter packing ------------------------

def pack_discriminator_params(params, *, param_dtype=jnp.float32):
    """Fuse the src/cls heads and zero-pad every layer to lane-dense slabs.

    Call ONCE at init; the returned (weights, biases) tuples are fed directly
    to `discriminator_forward` so no packing happens on the per-call path.

      weights[i]: (round_up(in_i,128), round_up(out_i,128)) in `param_dtype`
      biases[i] : (1, round_up(out_i,128)) in float32
    """
    hidden = params["hidden"]
    w_src, b_src = params["src"]
    w_cls, b_cls = params["cls"]

    # Fuse the two heads into one output-dim-concatenated layer: [src | cls].
    w_head = jnp.concatenate([w_src, w_cls], axis=1)
    b_head = jnp.concatenate([b_src, b_cls], axis=1)
    layers = list(hidden) + [(w_head, b_head)]

    weights, biases = [], []
    for w, b in layers:
        pin = _round_up(w.shape[0], LANE)
        pout = _round_up(w.shape[1], LANE)
        wp = jnp.zeros((pin, pout), param_dtype)
        wp = wp.at[: w.shape[0], : w.shape[1]].set(w.astype(param_dtype))
        bp = jnp.zeros((1, pout), jnp.float32).at[:, : b.shape[1]].set(b)
        weights.append(wp)
        biases.append(bp)
    return tuple(weights), tuple(biases)


# ------------------------------- forward -------------------------------------

def _resident_spec(shape, single_buffer):
    """BlockSpec for an operand that stays resident across the batch grid."""
    if single_buffer:
        return pl.BlockSpec(shape, lambda i: (0, 0),
                            pipeline_mode=pl.Buffered(1))
    return pl.BlockSpec(shape, lambda i: (0, 0))


def discriminator_forward(x, weights, biases, *, activation, lrelu_val,
                          num_classes, block_rows=None,
                          single_buffer_weights=False):
    """Runs the fused discriminator kernel.

    x:        (B, D_input_size)
    weights:  tuple of pre-packed padded weights (see pack_discriminator_params)
    biases:   tuple of pre-packed padded biases
    Returns (src, cls) with shapes (B, 1) and (B, num_classes).
    """
    B, d_in = x.shape
    L = len(weights)
    pins = [w.shape[0] for w in weights]
    pouts = [w.shape[1] for w in weights]
    p_out = pouts[-1]
    n_head = 1 + num_classes

    # Batch tiling: large tiles for narrow nets, but keep >= 2 grid steps once
    # the padded batch exceeds one sublane tile so v7x megacore splits rows.
    max_pad = max(pins + pouts)
    if block_rows is None:
        block_rows = 2048 if max_pad <= 256 else 512
    b_pad0 = _round_up(B, SUBLANE)
    tm = min(block_rows, b_pad0)
    if b_pad0 > SUBLANE:
        tm = min(tm, _round_up(-(-b_pad0 // 2), SUBLANE))
    b_pad = _round_up(b_pad0, tm)

    x_pad = jnp.zeros((b_pad, pins[0]), jnp.float32).at[:B, :d_in].set(x)

    lhs_dtype = weights[0].dtype
    kernel = _make_discriminator_kernel(L, activation, lrelu_val, lhs_dtype)

    in_specs = [pl.BlockSpec((tm, pins[0]), lambda i: (i, 0))]
    in_specs += [_resident_spec((pins[l], pouts[l]), single_buffer_weights)
                 for l in range(L)]
    in_specs += [_resident_spec((1, pouts[l]), single_buffer_weights)
                 for l in range(L)]

    # Cost estimate from per-layer padded dims & actual dtypes.
    w_itemsize = jnp.dtype(lhs_dtype).itemsize
    flops = int(sum(2 * b_pad * pins[l] * pouts[l] for l in range(L)))
    w_bytes = int(w_itemsize * sum(w.size for w in weights))
    b_bytes = int(4 * sum(b.size for b in biases))
    bytes_accessed = int(4 * x_pad.size + 4 * b_pad * p_out + w_bytes + b_bytes)

    # Explicit scoped-VMEM budget: double-buffered x/out tiles + resident
    # weight slabs (single- or double-buffered), 2x margin, 32 MiB..64 MiB.
    io_bytes = 4 * tm * (pins[0] + p_out)
    resident = (1 if single_buffer_weights else 2) * (w_bytes + b_bytes)
    need = 2 * io_bytes + resident
    vmem_limit = int(min(max(2 * need, 32 << 20), 64 << 20))

    out = pl.pallas_call(
        kernel,
        out_shape=jax.ShapeDtypeStruct((b_pad, p_out), jnp.float32),
        grid=(b_pad // tm,),
        in_specs=in_specs,
        out_specs=pl.BlockSpec((tm, p_out), lambda i: (i, 0)),
        compiler_params=pltpu.CompilerParams(
            dimension_semantics=("parallel",),
            vmem_limit_bytes=vmem_limit),
        cost_estimate=pl.CostEstimate(
            flops=flops, transcendentals=0, bytes_accessed=bytes_accessed),
    )(x_pad, *weights, *biases)

    src = out[:B, :1]
    cls = out[:B, 1:n_head]
    return src, cls


# --------------------------- parameter init ----------------------------------

def init_linear(key, dim_in, dim_out):
    """Deterministic init mimicking PyTorch nn.Linear defaults."""
    kw, kb = jax.random.split(key)
    bound = 1.0 / math.sqrt(dim_in)
    w = jax.random.uniform(kw, (dim_in, dim_out), jnp.float32, -bound, bound)
    b = jax.random.uniform(kb, (1, dim_out), jnp.float32, -bound, bound)
    return w, b


def init_discriminator(key, d_input, d_hidden, num_classes):
    keys = jax.random.split(key, len(d_hidden) + 2)
    hidden = []
    prev = d_input
    for i, h in enumerate(d_hidden):
        hidden.append(init_linear(keys[i], prev, h))
        prev = h
    w_src, b_src = init_linear(keys[len(d_hidden)], prev, 1)
    w_cls, b_cls = init_linear(keys[len(d_hidden) + 1], prev, num_classes)
    return {"hidden": hidden, "src": (w_src, b_src), "cls": (w_cls, b_cls)}


# ------------------------------ reference -----------------------------------

def reference_forward(x, params, *, activation, lrelu_val):
    h = x
    for w, b in params["hidden"]:
        h = h @ w + b
        if activation == "relu":
            h = jnp.maximum(h, 0.0)
        elif activation == "lrelu":
            h = jnp.where(h > 0, h, lrelu_val * h)
    w_src, b_src = params["src"]
    w_cls, b_cls = params["cls"]
    return h @ w_src + b_src, h @ w_cls + b_cls


# -------------------------------- main ---------------------------------------

if __name__ == "__main__":
    # opts: D_input_size=32, D_hidden=[64, 32], D_activation='lrelu',
    #       lrelu_val=0.2, num_classes=4
    B = 8
    D_INPUT = 32
    D_HIDDEN = [64, 32]
    NUM_CLASSES = 4
    ACTIVATION = "lrelu"
    LRELU_VAL = 0.2

    key = jax.random.PRNGKey(0)
    k_x, k_x2, k_p = jax.random.split(key, 3)
    x = jax.random.normal(k_x, (B, D_INPUT), jnp.float32)
    params = init_discriminator(k_p, D_INPUT, D_HIDDEN, NUM_CLASSES)

    # One-time packing (hoisted out of the per-call path).
    w_f32, b_f32 = pack_discriminator_params(params, param_dtype=jnp.float32)
    w_bf16, b_bf16 = pack_discriminator_params(params, param_dtype=jnp.bfloat16)
    w_f32, b_f32, w_bf16, b_bf16 = jax.block_until_ready(
        (w_f32, b_f32, w_bf16, b_bf16))

    single_buffer = _single_buffer_supported()

    fwd = jax.jit(functools.partial(
        discriminator_forward, activation=ACTIVATION, lrelu_val=LRELU_VAL,
        num_classes=NUM_CLASSES, single_buffer_weights=single_buffer))

    # 1) f32 path: exact forward-pass semantics of the PyTorch module.
    src, cls = jax.block_until_ready(fwd(x, w_f32, b_f32))
    src_ref, cls_ref = reference_forward(
        x, params, activation=ACTIVATION, lrelu_val=LRELU_VAL)
    assert src.shape == (B, 1) and cls.shape == (B, NUM_CLASSES)
    assert jnp.allclose(src, src_ref, atol=1e-4, rtol=1e-4)
    assert jnp.allclose(cls, cls_ref, atol=1e-4, rtol=1e-4)

    # 2) Multi-step ("parallel") batch grid: exercises the >=2-step megacore
    #    split and padded batch rows.
    B2 = 24
    x2 = jax.random.normal(k_x2, (B2, D_INPUT), jnp.float32)
    src2, cls2 = jax.block_until_ready(fwd(x2, w_f32, b_f32))
    src2_ref, cls2_ref = reference_forward(
        x2, params, activation=ACTIVATION, lrelu_val=LRELU_VAL)
    assert src2.shape == (B2, 1) and cls2.shape == (B2, NUM_CLASSES)
    assert jnp.allclose(src2, src2_ref, atol=1e-4, rtol=1e-4)
    assert jnp.allclose(cls2, cls2_ref, atol=1e-4, rtol=1e-4)

    # 3) bf16-weight MXU fast path (v6e/v7x): f32 accumulation, looser tol.
    src16, cls16 = jax.block_until_ready(fwd(x, w_bf16, b_bf16))
    assert jnp.allclose(src16, src_ref, atol=5e-2, rtol=5e-2)
    assert jnp.allclose(cls16, cls_ref, atol=5e-2, rtol=5e-2)

    print("KERNEL_OK")
</pallas_src>

<mosaic_0001>
module attributes {stable_mosaic.version = 11 : i64} {
  func.func @k(%arg0: i32, %arg1: memref<8x128xf32, #tpu.memory_space<vmem>>, %arg2: memref<8x128xf32, #tpu.memory_space<vmem>>, %arg3: memref<8x128xf32, #tpu.memory_space<vmem>>) attributes {dimension_semantics = [#tpu.dimension_semantics<arbitrary>], iteration_bounds = array<i64: 2>, scalar_prefetch = 0 : i64, scratch_operands = 0 : i64, tpu.core_type = #tpu.core_type<tc>, window_params = [{transform_indices = @transform_0, window_bounds = array<i64: 8, 128>}, {pipeline_mode = #tpu.pipeline_mode<synchronous>, transform_indices = @transform_1, window_bounds = array<i64: 8, 128>}, {transform_indices = @transform_2, window_bounds = array<i64: 8, 128>}]} {
    %c0 = arith.constant 0 : index
    %c0_0 = arith.constant 0 : index
    %0 = vector.load %arg1[%c0, %c0_0] : memref<8x128xf32, #tpu.memory_space<vmem>>, vector<8x128xf32>
    %c0_1 = arith.constant 0 : index
    %c0_2 = arith.constant 0 : index
    %1 = vector.load %arg2[%c0_1, %c0_2] : memref<8x128xf32, #tpu.memory_space<vmem>>, vector<8x128xf32>
    %2 = arith.addf %0, %1 : vector<8x128xf32>
    %c0_3 = arith.constant 0 : index
    %c0_4 = arith.constant 0 : index
    %3 = vector.load %arg3[%c0_3, %c0_4] : memref<8x128xf32, #tpu.memory_space<vmem>>, vector<8x128xf32>
    tpu.vector_store %arg3[%c0_3, %c0_4], %2 {strides = array<i32>} : memref<8x128xf32, #tpu.memory_space<vmem>>, vector<8x128xf32>,
    return
  }
  func.func @transform_0(%arg0: i32) -> (i32, i32) {
    %c0_i32 = arith.constant 0 : i32
    %c0_i32_0 = arith.constant 0 : i32
    return %arg0, %c0_i32 : i32, i32
  }
  func.func @transform_1(%arg0: i32) -> (i32, i32) {
    %c0_i32 = arith.constant 0 : i32
    %c0_i32_0 = arith.constant 0 : i32
    %c0_i32_1 = arith.constant 0 : i32
    return %c0_i32, %c0_i32_0 : i32, i32
  }
  func.func @transform_2(%arg0: i32) -> (i32, i32) {
    %c0_i32 = arith.constant 0 : i32
    %c0_i32_0 = arith.constant 0 : i32
    return %arg0, %c0_i32 : i32, i32
  }
}

module attributes {stable_mosaic.version = 11 : i64} {
  func.func @kernel(%arg0: i32, %arg1: memref<8x128xf32, #tpu.memory_space<vmem>>, %arg2: memref<128x128xf32, #tpu.memory_space<vmem>>, %arg3: memref<128x128xf32, #tpu.memory_space<vmem>>, %arg4: memref<128x128xf32, #tpu.memory_space<vmem>>, %arg5: memref<1x128xf32, #tpu.memory_space<vmem>>, %arg6: memref<1x128xf32, #tpu.memory_space<vmem>>, %arg7: memref<1x128xf32, #tpu.memory_space<vmem>>, %arg8: memref<8x128xf32, #tpu.memory_space<vmem>>) attributes {dimension_semantics = [#tpu.dimension_semantics<parallel>], iteration_bounds = array<i64: 1>, scalar_prefetch = 0 : i64, scratch_operands = 0 : i64, tpu.core_type = #tpu.core_type<tc>, window_params = [{transform_indices = @transform_0, window_bounds = array<i64: 8, 128>}, {pipeline_mode = #tpu.pipeline_mode<synchronous>, transform_indices = @transform_1, window_bounds = array<i64: 128, 128>}, {pipeline_mode = #tpu.pipeline_mode<synchronous>, transform_indices = @transform_2, window_bounds = array<i64: 128, 128>}, {pipeline_mode = #tpu.pipeline_mode<synchronous>, transform_indices = @transform_3, window_bounds = array<i64: 128, 128>}, {pipeline_mode = #tpu.pipeline_mode<synchronous>, transform_indices = @transform_4, window_bounds = array<i64: 1, 128>}, {pipeline_mode = #tpu.pipeline_mode<synchronous>, transform_indices = @transform_5, window_bounds = array<i64: 1, 128>}, {pipeline_mode = #tpu.pipeline_mode<synchronous>, transform_indices = @transform_6, window_bounds = array<i64: 1, 128>}, {transform_indices = @transform_7, window_bounds = array<i64: 8, 128>}]} {
    %c0 = arith.constant 0 : index
    %c0_0 = arith.constant 0 : index
    %0 = vector.load %arg1[%c0, %c0_0] : memref<8x128xf32, #tpu.memory_space<vmem>>, vector<8x128xf32>
    %c0_1 = arith.constant 0 : index
    %c0_2 = arith.constant 0 : index
    %1 = vector.load %arg2[%c0_1, %c0_2] : memref<128x128xf32, #tpu.memory_space<vmem>>, vector<128x128xf32>
    %cst = arith.constant dense<0.000000e+00> : vector<8x128xf32>
    %2 = tpu.matmul %0, %1, %cst {dimension_numbers = #tpu.dot_dimension_numbers<[1], [0], [0], [1], [0, 0, 1, 1], [], []>} : vector<8x128xf32>, vector<128x128xf32>, vector<8x128xf32> -> vector<8x128xf32>
    %c0_3 = arith.constant 0 : index
    %c0_4 = arith.constant 0 : index
    %3 = vector.load %arg5[%c0_3, %c0_4] : memref<1x128xf32, #tpu.memory_space<vmem>>, vector<1x128xf32>
    %4 = vector.broadcast %3 : vector<1x128xf32> to vector<8x128xf32>
    %5 = arith.addf %2, %4 : vector<8x128xf32>
    %cst_5 = arith.constant 2.000000e-01 : f32
    %6 = vector.broadcast %cst_5 : f32 to vector<8x128xf32>
    %7 = arith.mulf %6, %5 : vector<8x128xf32>
    %8 = arith.maximumf %5, %7 : vector<8x128xf32>
    %c0_6 = arith.constant 0 : index
    %c0_7 = arith.constant 0 : index
    %9 = vector.load %arg3[%c0_6, %c0_7] : memref<128x128xf32, #tpu.memory_space<vmem>>, vector<128x128xf32>
    %cst_8 = arith.constant dense<0.000000e+00> : vector<8x128xf32>
    %10 = tpu.matmul %8, %9, %cst_8 {dimension_numbers = #tpu.dot_dimension_numbers<[1], [0], [0], [1], [0, 0, 1, 1], [], []>} : vector<8x128xf32>, vector<128x128xf32>, vector<8x128xf32> -> vector<8x128xf32>
    %c0_9 = arith.constant 0 : index
    %c0_10 = arith.constant 0 : index
    %11 = vector.load %arg6[%c0_9, %c0_10] : memref<1x128xf32, #tpu.memory_space<vmem>>, vector<1x128xf32>
    %12 = vector.broadcast %11 : vector<1x128xf32> to vector<8x128xf32>
    %13 = arith.addf %10, %12 : vector<8x128xf32>
    %cst_11 = arith.constant 2.000000e-01 : f32
    %14 = vector.broadcast %cst_11 : f32 to vector<8x128xf32>
    %15 = arith.mulf %14, %13 : vector<8x128xf32>
    %16 = arith.maximumf %13, %15 : vector<8x128xf32>
    %c0_12 = arith.constant 0 : index
    %c0_13 = arith.constant 0 : index
    %17 = vector.load %arg4[%c0_12, %c0_13] : memref<128x128xf32, #tpu.memory_space<vmem>>, vector<128x128xf32>
    %cst_14 = arith.constant dense<0.000000e+00> : vector<8x128xf32>
    %18 = tpu.matmul %16, %17, %cst_14 {dimension_numbers = #tpu.dot_dimension_numbers<[1], [0], [0], [1], [0, 0, 1, 1], [], []>} : vector<8x128xf32>, vector<128x128xf32>, vector<8x128xf32> -> vector<8x128xf32>
    %c0_15 = arith.constant 0 : index
    %c0_16 = arith.constant 0 : index
    %19 = vector.load %arg7[%c0_15, %c0_16] : memref<1x128xf32, #tpu.memory_space<vmem>>, vector<1x128xf32>
    %20 = vector.broadcast %19 : vector<1x128xf32> to vector<8x128xf32>
    %21 = arith.addf %18, %20 : vector<8x128xf32>
    %c0_17 = arith.constant 0 : index
    %c0_18 = arith.constant 0 : index
    %22 = vector.load %arg8[%c0_17, %c0_18] : memref<8x128xf32, #tpu.memory_space<vmem>>, vector<8x128xf32>
    tpu.vector_store %arg8[%c0_17, %c0_18], %21 {strides = array<i32>} : memref<8x128xf32, #tpu.memory_space<vmem>>, vector<8x128xf32>,
    return
  }
  func.func @transform_0(%arg0: i32) -> (i32, i32) {
    %c0_i32 = arith.constant 0 : i32
    %c0_i32_0 = arith.constant 0 : i32
    return %arg0, %c0_i32 : i32, i32
  }
  func.func @transform_1(%arg0: i32) -> (i32, i32) {
    %c0_i32 = arith.constant 0 : i32
    %c0_i32_0 = arith.constant 0 : i32
    %c0_i32_1 = arith.constant 0 : i32
    return %c0_i32, %c0_i32_0 : i32, i32
  }
  func.func @transform_2(%arg0: i32) -> (i32, i32) {
    %c0_i32 = arith.constant 0 : i32
    %c0_i32_0 = arith.constant 0 : i32
    %c0_i32_1 = arith.constant 0 : i32
    return %c0_i32, %c0_i32_0 : i32, i32
  }
  func.func @transform_3(%arg0: i32) -> (i32, i32) {
    %c0_i32 = arith.constant 0 : i32
    %c0_i32_0 = arith.constant 0 : i32
    %c0_i32_1 = arith.constant 0 : i32
    return %c0_i32, %c0_i32_0 : i32, i32
  }
  func.func @transform_4(%arg0: i32) -> (i32, i32) {
    %c0_i32 = arith.constant 0 : i32
    %c0_i32_0 = arith.constant 0 : i32
    %c0_i32_1 = arith.constant 0 : i32
    return %c0_i32, %c0_i32_0 : i32, i32
  }
  func.func @transform_5(%arg0: i32) -> (i32, i32) {
    %c0_i32 = arith.constant 0 : i32
    %c0_i32_0 = arith.constant 0 : i32
    %c0_i32_1 = arith.constant 0 : i32
    return %c0_i32, %c0_i32_0 : i32, i32
  }
  func.func @transform_6(%arg0: i32) -> (i32, i32) {
    %c0_i32 = arith.constant 0 : i32
    %c0_i32_0 = arith.constant 0 : i32
    %c0_i32_1 = arith.constant 0 : i32
    return %c0_i32, %c0_i32_0 : i32, i32
  }
  func.func @transform_7(%arg0: i32) -> (i32, i32) {
    %c0_i32 = arith.constant 0 : i32
    %c0_i32_0 = arith.constant 0 : i32
    return %arg0, %c0_i32 : i32, i32
  }
}

</mosaic_0001>

<bundles_post_ra>
// kernel: tpu_custom_call.1
= control target key start
LH: loop header
LB: loop body
LE: loop exit
PB: predicated region body
PF: predicated region fallthrough
CT: control target
= control target key end

     0   :  { %7 = vsyncpa [#allocation3], 0  ;;  %s649_s0 = inlined_call_operand.hbm [shape: f32[16,128], index: 0, kind: input, shape index: {}]   ;;  %s650_s1 = inlined_call_operand.hbm [shape: f32[8,128], index: 1, kind: input, shape index: {}]   ;;  %s651_s2 = inlined_call_operand.hbm [shape: f32[16,128], index: 2, kind: output, shape index: {}]  }
   0x1   :  { %9 = vsyncpa [#allocation3 + $0x1], 0 }
   0x2   :  { %10 = vsyncpa [#allocation6], 0 }
   0x3   :  { %11 = vsyncpa [#allocation4], 0 }
   0x4   :  { %13 = vsyncpa [#allocation4 + $0x1], 0  ;;  %s483_s9 = smov 0   ;;  %s485_s10 = smov 0  }
   0x5   :  { %s487_s11 = smov 0   ;;  %s489_s12 = smov 0  }
   0x6 LB: > { %s504_s13 = sadd.s32 4294967295, %s463_s12   ;;  %s270_s14 = sadd.s32 4294967294, %s463_s12   ;;  %s463_s12 = sphi %s489_s12, %s674_s12   ;;  %s459_s11 = sphi %s487_s11, %s673_s11   ;;  %s455_s10 = sphi %s485_s10, %s672_s10   ;;  %s451_s9 = sphi %s483_s9, %s671_s9  }
   0x7   : > { %p39_p0 = scmp.ne.s32.totalorder %s455_s10, %s451_s9  ;;  %p652_p1 = scmp.eq.s32.totalorder %s504_s13, 0 }
   0x8   : > { %p90_p3 = scmp.eq.s32.totalorder %s270_s14, 1  ;;  %p271_p5 = scmp.ge.s32.totalorder %s463_s12, 1 }
   0x9   : > { %p513_p4 = por %p652_p1, %p39_p0  ;;  %p97_p7 = scmp.lt.s32.totalorder %s463_s12, 3 }
   0xa   : > { %p518_p6 = por %p90_p3, %p39_p0  ;;  %s465_s18 = smov [#allocation5]  }
   0xb   : > { %s656_s15 = scalar_select %p513_p4, 1, 0 }
   0xc   : > { %s657_s16 = scalar_select %p518_p6, 1, 0 }
   0xd   : > { %p523_p8 = pnand %p271_p5, %p97_p7  ;;  %s110_s19 = sshll.u32 %s465_s18, 4  ;;  %s111_s19 = int_to_ptr.vmem [resolvable:$true] %s110_s19 }
   0xe   : > { %s531_s20 = sadd.s32 1, %s463_s12   ;;  %s26_s24 = sadd.s32 1, %s459_s11 }
   0xf   : > { %s658_s17 = scalar_select %p523_p8, 1, 0 }
  0x10   : > { %p292_p10 = pneg %p523_p8  ;;  %s23_s22 = ssub.s32 %s463_s12, %s531_s20 }
  0x11   : > { %p541_p12 = scmp.eq.s32.totalorder %s23_s22, 0  ;;  %p33_p13 = scmp.ne.s32.totalorder %s459_s11, %s455_s10 }
  0x12   : > { %p535_p11 = pnand %p292_p10, %p652_p1  ;;  %s352_s25 = scalar_lea.vmem %s111_s19, 128 }
  0x13   : > { %p353_p3 = scmp.ne.s32.totalorder %s111_s19, %s352_s25  ;;  %p360_p9 = scmp.lt.s32.totalorder %s111_s19, %s111_s19 }
  0x14   : > { %p343_p0 = pneg %p535_p11  ;;  %p361_p2 = scmp.lt.s32.totalorder %s352_s25, %s352_s25 }
  0x16   : > { %p355_p5 = pnand %p353_p3, %p343_p0  ;;  %p362_p10 = por %p361_p2, %p360_p9 }
  0x18   : > { %p356_p7 = pneg %p355_p5 }
  0x1a   : > { %p363_p1 = pnand %p362_p10, %p356_p7 }
  0x1c   : > { %366 = shalt.err (!%p363_p1)
}
  0x1d   : > { %295 = dma.hbm_to_vmem [thread:$0]  (!%p535_p11), %s650_s1, 128, %s111_s19, [#allocation6]  }
  0x1e   : > { %s558_s28 = scalar_select %p541_p12, %s459_s11, %s26_s24  }
  0x1f   : > { %p34_p1 = scmp.eq.s32.totalorder %s463_s12, 0  ;;  %p661_p2 = scmp.eq.s32.totalorder %s504_s13, 1 }
  0x20   : > { %p305_p0 = scmp.lt.s32.totalorder %s463_s12, 2  ;;  %s121_s30 = sand.u32 1, %s459_s11  }
  0x21   : > { %p566_p9 = por %p661_p2, %p33_p13  ;;  %p35_p3 = por %p34_p1, %p33_p13 }
  0x22   : > { %s274_s3 = sshll.u32 %s121_s30, 3  ;;  %s275_s4 = sshll.u32 %s463_s12, 7 }
  0x23   : > { %s662_s29 = scalar_select %p566_p9, 1, 0 }
  0x24   : > { %s579_s7 = scalar_lea.hbm %s649_s0, %s275_s4  ;;  %s125_s8 = scalar_lea.vmem [#allocation2], %s274_s3 }
  0x25   : > { %s132_s14 = sshll.u32 %s125_s8, 4  ;;  %p581_p11 = pnand %p305_p0, %p35_p3  ;;  %s133_s14 = int_to_ptr.vmem [resolvable:$true] %s132_s14 }
  0x26   : > { %s122_s19 = scalar_lea.sflag [#allocation3], %s121_s30  ;;  %s367_s21 = scalar_lea.hbm %s579_s7, 128 }
  0x27   : > { %p368_p12 = scmp.ne.s32.totalorder %s579_s7, %s367_s21  ;;  %p369_p13 = pneg %p581_p11 }
  0x28   : > { %s372_s24 = scalar_lea.hbm %s649_s0, 256  ;;  %p373_p10 = scmp.lt.s32.totalorder %s579_s7, %s649_s0 }
  0x29   : > { %p370_p5 = pnand %p369_p13, %p368_p12  ;;  %p374_p1 = scmp.lt.s32.totalorder %s372_s24, %s367_s21 }
  0x2b   : > { %p371_p7 = pneg %p370_p5  ;;  %p375_p2 = por %p374_p1, %p373_p10 }
  0x2d   : > { %p376_p0 = pnand %p375_p2, %p371_p7 }
  0x2f   : > { %379 = shalt.err (!%p376_p0)
}
  0x30   : > { %s380_s27 = scalar_lea.vmem %s133_s14, 128  ;;  %s466_s30 = smov [#allocation2]  }
  0x31   : > { %p381_p3 = scmp.ne.s32.totalorder %s133_s14, %s380_s27  ;;  %s385_s3 = sshll.u32 %s466_s30, 4  ;;  %s386_s3 = int_to_ptr.vmem [resolvable:$false] %s385_s3 }
  0x32   : > { %s387_s4 = scalar_lea.vmem %s386_s3, 256  ;;  %p388_p12 = scmp.lt.s32.totalorder %s133_s14, %s386_s3 }
  0x33   : > { %p383_p6 = pnand %p381_p3, %p369_p13  ;;  %p389_p5 = scmp.lt.s32.totalorder %s387_s4, %s380_s27 }
  0x35   : > { %p384_p9 = pneg %p383_p6  ;;  %p390_p4 = por %p389_p5, %p388_p12 }
  0x37   : > { %p391_p8 = pnand %p390_p4, %p384_p9 }
  0x39   : > { %394 = shalt.err (!%p391_p8)
}
  0x3a   : > { %299 = dma.hbm_to_vmem [thread:$0]  (!%p581_p11), %s579_s7, 128, %s133_s14, %s122_s19  }
  0x3b   : > { %p664_p7 = scmp.ne.s32.totalorder %s658_s17, 0 }
  0x3c   : > { %s602_s5 = sand.u32 (!%p664_p7), 1, %s455_s10   ;;  %p665_p6 = scmp.ne.s32.totalorder (!%p664_p7), %s656_s15, 0 }
  0x3d   : > { %141 = sbr.rel (%p664_p7) target bundleno = 95 (0x5f), region = 28  ;;  %s277_s6 = sshll.u32 (!%p664_p7), %s602_s5, 3 }
  0x3e   : > { %s144_s8 = scalar_lea.sflag (!%p664_p7), [#allocation3], %s602_s5  ;;  %s147_s21 = scalar_lea.vmem (!%p664_p7), [#allocation2], %s277_s6 }
  0x42   : > { %438 = dma.done.wait (%p665_p6), %s144_s8, 128  }
  0x43   : > { %440 = vsyncadd (%p665_p6), %s144_s8, 4294967168  ;;  %p666_p4 = scmp.eq.s32.totalorder %s504_s13, 0 }
  0x45   : > { %442 = dma.done.wait (%p666_p4), [#allocation6], 128   ;;  %p667_p8 = pmov %p666_p4 }
  0x46   : > { %s171_s17 = scalar_lea.vmem [#allocation7], %s277_s6  ;;  %s281_s14 = sshll.u32 %s504_s13, 7  ;;  %v172_v0 = vld [vmem:[%s147_s21] sm:$0xff]  ;;  %v173_v1 = vld [vmem:[#allocation5] sm:$0xff] }
  0x47   : > { %444 = vsyncadd (%p667_p8), [#allocation6], 4294967168  ;;  %s190_s7 = sshll.u32 %s171_s17, 4  ;;  %v174_v2 = vadd.f32 %v173_v1, %v172_v0  ;;  %s188_s15 = scalar_lea.hbm %s651_s2, %s281_s14  ;;  %s191_s7 = int_to_ptr.vmem [resolvable:$true] %s190_s7 }
  0x48   : > { %s177_s22 = scalar_lea.sflag [#allocation4], %s602_s5  ;;  %s395_s23 = scalar_lea.vmem %s191_s7, 128 }
  0x49   : > { %175 = vst [vmem:[%s171_s17] sm:$0xff] %v174_v2  ;;  %p396_p9 = scmp.ne.s32.totalorder %s191_s7, %s395_s23  ;;  %p668_p11 = scmp.ne.s32.totalorder %s662_s29, 0 }
  0x4a   : > { %s467_s24 = smov [#allocation7]  }
  0x4b   : > { %p397_p13 = pnand %p396_p9, %p668_p11  ;;  %s399_s25 = sshll.u32 %s467_s24, 4  ;;  %s400_s25 = int_to_ptr.vmem [resolvable:$false] %s399_s25 }
  0x4c   : > { %s401_s26 = scalar_lea.vmem %s400_s25, 256  ;;  %p402_p1 = scmp.lt.s32.totalorder %s191_s7, %s400_s25 }
  0x4d   : > { %p398_p10 = pneg %p397_p13  ;;  %p403_p2 = scmp.lt.s32.totalorder %s401_s26, %s395_s23 }
  0x4f   : > { %p404_p0 = por %p403_p2, %p402_p1 }
  0x51   : > { %p405_p3 = pnand %p404_p0, %p398_p10 }
  0x53   : > { %408 = shalt.err (!%p405_p3)
}
  0x54   : > { %s409_s13 = scalar_lea.hbm %s188_s15, 128  ;;  %s413_s3 = scalar_lea.hbm %s651_s2, 256 }
  0x55   : > { %p410_p12 = scmp.ne.s32.totalorder %s188_s15, %s409_s13  ;;  %p414_p6 = scmp.lt.s32.totalorder %s188_s15, %s651_s2 }
  0x56   : > { %p415_p4 = scmp.lt.s32.totalorder %s413_s3, %s409_s13 }
  0x57   : > { %p411_p5 = pnand %p410_p12, %p668_p11 }
  0x58   : > { %p416_p8 = por %p415_p4, %p414_p6 }
  0x59   : > { %p412_p7 = pneg %p411_p5 }
  0x5b   : > { %p417_p9 = pnand %p416_p8, %p412_p7 }
  0x5d   : > { %420 = shalt.err (!%p417_p9)
}
  0x5e   : > { %290 = dma.vmem_to_hbm [thread:$0]  (%p668_p11), %s191_s7, 128, %s188_s15, %s177_s22  }
  0x5f PF: > { %s202_s6 = sand.u32 1, %s451_s9   ;;  %p669_p13 = scmp.ne.s32.totalorder %s657_s16, 0 }
  0x60   : > { %p670_p10 = scmp.ge.s32.totalorder %s463_s12, 2  ;;  %s203_s8 = scalar_lea.sflag [#allocation4], %s202_s6 }
  0x62   : > { %p301_p1 = pnand %p670_p10, %p669_p13 }
  0x64   : > { %p302_p2 = pneg %p301_p1 }
  0x66   : > { %446 = dma.done.wait (%p302_p2), %s203_s8, 128  }
  0x67   : > { %448 = vsyncadd (%p302_p2), %s203_s8, 4294967168  ;;  %p16_p0 = scmp.ge.s32.totalorder %s531_s20, 4   ;;  %s671_s9 = smov %s455_s10 }
  0x68   : > { %s672_s10 = smov %s459_s11  ;;  %s673_s11 = smov %s558_s28 }
  0x69   : > { %s674_s12 = smov %s531_s20  ;;  %18 = sbr.rel (!%p16_p0) target bundleno = 6 (0x6), region = 77 }
  0x6e   :  { %208 = vsyncpa [#allocation3], 1 }
  0x6f   :  { %210 = vsyncpa [#allocation3 + $0x1], 1 }
  0x70   :  { %211 = vsyncpa [#allocation6], 1 }
  0x71   :  { %212 = vsyncpa [#allocation4], 1 }
  0x72   :  { %214 = vsyncpa [#allocation4 + $0x1], 1 }

// kernel: discriminator_forward.1
= control target key start
LH: loop header
LB: loop body
LE: loop exit
PB: predicated region body
PF: predicated region fallthrough
CT: control target
= control target key end

     0   :  { %12 = vsyncpa [#allocation3], 0  ;;  %s713_s0 = inlined_call_operand.vmem [shape: f32[8,128], index: 0, kind: input, shape index: {}]   ;;  %s714_s1 = inlined_call_operand.hbm [shape: f32[128,128], index: 1, kind: input, shape index: {}]   ;;  %s715_s2 = inlined_call_operand.hbm [shape: f32[128,128], index: 2, kind: input, shape index: {}]   ;;  %s716_s3 = inlined_call_operand.hbm [shape: f32[128,128], index: 3, kind: input, shape index: {}]   ;;  %s717_s4 = inlined_call_operand.vmem [shape: f32[1,128], index: 4, kind: input, shape index: {}]   ;;  %s718_s5 = inlined_call_operand.vmem [shape: f32[1,128], index: 5, kind: input, shape index: {}]   ;;  %s719_s6 = inlined_call_operand.vmem [shape: f32[1,128], index: 6, kind: input, shape index: {}]   ;;  %s720_s7 = inlined_call_operand.vmem [shape: f32[8,128], index: 7, kind: output, shape index: {}]  }
   0x1   :  { %13 = vsyncpa [#allocation5], 0  ;;  %s588_s24 = smov [#allocation4]   ;;  %s589_s26 = smov [#allocation2]  }
   0x2   :  { %s33_s25 = sshll.u32 %s588_s24, 4  ;;  %s21_s27 = sshll.u32 %s589_s26, 4  ;;  %s34_s25 = int_to_ptr.vmem [resolvable:$true] %s33_s25  ;;  %s22_s27 = int_to_ptr.vmem [resolvable:$true] %s21_s27 }
   0x3   :  { %s532_s28 = scalar_lea.vmem %s34_s25, 2048  ;;  %p537_p1 = scmp.lt.s32.totalorder %s34_s25, %s34_s25 }
   0x4   :  { %p533_p0 = scmp.ne.s32.totalorder %s34_s25, %s532_s28  ;;  %p538_p2 = scmp.lt.s32.totalorder %s532_s28, %s532_s28 }
   0x6   :  { %p539_p3 = por %p538_p2, %p537_p1 }
   0x8   :  { %p540_p4 = pnand %p539_p3, %p533_p0 }
   0xa   :  { %543 = shalt.err (!%p540_p4)
}
   0xb   :  { %s590_s29 = smov 128   ;;  %s591_s30 = smov 8  }
   0xc   :  { %39 = dma.hbm_to_vmem [thread:$0]  %s715_s2, 2048, %s34_s25, [#allocation5], %s590_s29, %s590_s29, %s591_s30  }
   0xd   :  { %s552_s10 = scalar_lea.vmem %s22_s27, 2048  ;;  %p557_p6 = scmp.lt.s32.totalorder %s22_s27, %s22_s27 }
   0xe   :  { %p553_p5 = scmp.ne.s32.totalorder %s22_s27, %s552_s10  ;;  %p558_p7 = scmp.lt.s32.totalorder %s552_s10, %s552_s10 }
  0x10   :  { %p559_p8 = por %p558_p7, %p557_p6 }
  0x12   :  { %p560_p9 = pnand %p559_p8, %p553_p5 }
  0x14   :  { %563 = shalt.err (!%p560_p9)
}
  0x15   :  { %27 = dma.hbm_to_vmem [thread:$0]  %s714_s1, 2048, %s22_s27, [#allocation3], %s590_s29, %s590_s29, %s591_s30  }
  0x16   :  { %s592_s13 = smov [#allocation6]  }
  0x17   :  { %s45_s14 = sshll.u32 %s592_s13, 4  ;;  %s46_s14 = int_to_ptr.vmem [resolvable:$true] %s45_s14 }
  0x18   :  { %s572_s15 = scalar_lea.vmem %s46_s14, 2048  ;;  %p577_p11 = scmp.lt.s32.totalorder %s46_s14, %s46_s14 }
  0x19   :  { %p573_p10 = scmp.ne.s32.totalorder %s46_s14, %s572_s15  ;;  %p578_p12 = scmp.lt.s32.totalorder %s572_s15, %s572_s15 }
  0x1b   :  { %p579_p13 = por %p578_p12, %p577_p11 }
  0x1d   :  { %p580_p0 = pnand %p579_p13, %p573_p10 }
  0x1f   :  { %583 = shalt.err (!%p580_p0)
}
  0x20   :  { %51 = dma.hbm_to_vmem [thread:$0]  %s716_s3, 2048, %s46_s14, [#allocation5], %s590_s29, %s590_s29, %s591_s30  }
  0x21   :  { %584 = dma.done.wait [#allocation3], 2048  }
  0x22   :  { %585 = vsyncadd [#allocation3], 4294965248 }
  0x23   :  { %586 = dma.done.wait [#allocation5], 4096  }
  0x24   :  { %587 = vsyncadd [#allocation5], 4294963200  ;;  %v593_v0 = vmov 0.0   ;;  %vm594_vm0 = vmmov 0   ;;  %v83_v1 = vld [vmem:[#allocation2 + $0x78] sm:$0xff]  ;;  %v82_v2 = vld [vmem:[#allocation2 + $0x70] sm:$0xff] }
  0x25   :  { %412 = vmatprep.subr.mxu0 %v593_v0  ;;  %444 = vmatprep.mubr.msk.f32.mxu0 %vm594_vm0, %v593_v0  ;;  %v81_v3 = vld [vmem:[#allocation2 + $0x68] sm:$0xff]  ;;  %v80_v4 = vld [vmem:[#allocation2 + $0x60] sm:$0xff]  ;;  %v178_v5 = vld [vmem:[#allocation4 + $0x78] sm:$0xff] }
  0x26   :  { %447 = vmatprep.subr.mxu1 %v593_v0  ;;  %479 = vmatprep.mubr.msk.f32.mxu1 %vm594_vm0, %v593_v0  ;;  %v79_v6 = vld [vmem:[#allocation2 + $0x58] sm:$0xff]  ;;  %v177_v7 = vld [vmem:[#allocation4 + $0x70] sm:$0xff]  ;;  %v176_v8 = vld [vmem:[#allocation4 + $0x68] sm:$0xff] }
  0x27   :  { %413 = vmatpush3.msra.mxu0 %v83_v1  ;;  %448 = vmatpush3.msra.mxu1 %v178_v5  ;;  %v78_v9 = vld [vmem:[#allocation2 + $0x50] sm:$0xff]  ;;  %v175_v10 = vld [vmem:[#allocation4 + $0x60] sm:$0xff]  ;;  %v77_v11 = vld [vmem:[#allocation2 + $0x48] sm:$0xff] }
  0x28   :  { %414 = vmatprep.subr.mxu0 %v593_v0  ;;  %449 = vmatprep.subr.mxu1 %v593_v0  ;;  %v174_v12 = vld [vmem:[#allocation4 + $0x58] sm:$0xff]  ;;  %v76_v13 = vld [vmem:[#allocation2 + $0x40] sm:$0xff]  ;;  %v173_v14 = vld [vmem:[#allocation4 + $0x50] sm:$0xff] }
  0x29   :  { %415 = vmatpush3.msra.mxu0 %v82_v2  ;;  %450 = vmatpush3.msra.mxu1 %v177_v7  ;;  %v75_v15 = vld [vmem:[#allocation2 + $0x38] sm:$0xff]  ;;  %v172_v16 = vld [vmem:[#allocation4 + $0x48] sm:$0xff]  ;;  %v74_v17 = vld [vmem:[#allocation2 + $0x30] sm:$0xff] }
  0x2a   :  { %416 = vmatprep.subr.mxu0 %v593_v0  ;;  %451 = vmatprep.subr.mxu1 %v593_v0  ;;  %v171_v18 = vld [vmem:[#allocation4 + $0x40] sm:$0xff]  ;;  %v73_v19 = vld [vmem:[#allocation2 + $0x28] sm:$0xff]  ;;  %v170_v20 = vld [vmem:[#allocation4 + $0x38] sm:$0xff] }
  0x2b   :  { %417 = vmatpush3.msra.mxu0 %v81_v3  ;;  %452 = vmatpush3.msra.mxu1 %v176_v8  ;;  %v72_v21 = vld [vmem:[#allocation2 + $0x20] sm:$0xff]  ;;  %v169_v22 = vld [vmem:[#allocation4 + $0x30] sm:$0xff]  ;;  %v71_v23 = vld [vmem:[#allocation2 + $0x18] sm:$0xff] }
  0x2c   :  { %418 = vmatprep.subr.mxu0 %v593_v0  ;;  %453 = vmatprep.subr.mxu1 %v593_v0  ;;  %v168_v24 = vld [vmem:[#allocation4 + $0x28] sm:$0xff]  ;;  %v70_v25 = vld [vmem:[#allocation2 + $0x10] sm:$0xff]  ;;  %v167_v26 = vld [vmem:[#allocation4 + $0x20] sm:$0xff] }
  0x2d   :  { %419 = vmatpush3.msra.mxu0 %v80_v4  ;;  %454 = vmatpush3.msra.mxu1 %v175_v10  ;;  %v69_v27 = vld [vmem:[#allocation2 + $0x8] sm:$0xff]  ;;  %v68_v28 = vld [vmem:[#allocation2] sm:$0xff]  ;;  %v166_v30 = vld [vmem:[#allocation4 + $0x18] sm:$0xff] }
  0x2e   :  { %420 = vmatprep.subr.mxu0 %v593_v0  ;;  %455 = vmatprep.subr.mxu1 %v593_v0  ;;  %v67_v29 = vld [vmem:[%s713_s0] sm:$0xff]  ;;  %v165_v31 = vld [vmem:[#allocation4 + $0x10] sm:$0xff]  ;;  %v164_v32 = vld [vmem:[#allocation4 + $0x8] sm:$0xff] }
  0x2f   :  { %421 = vmatpush3.msra.mxu0 %v79_v6  ;;  %456 = vmatpush3.msra.mxu1 %v174_v12  ;;  %v163_v33 = vld [vmem:[#allocation4] sm:$0xff]  ;;  %v273_v34 = vld [vmem:[#allocation6 + $0x78] sm:$0xff]  ;;  %v272_v35 = vld [vmem:[#allocation6 + $0x70] sm:$0xff] }
  0x30   :  { %422 = vmatprep.subr.mxu0 %v593_v0  ;;  %457 = vmatprep.subr.mxu1 %v593_v0  ;;  %v271_v36 = vld [vmem:[#allocation6 + $0x68] sm:$0xff]  ;;  %v270_v37 = vld [vmem:[#allocation6 + $0x60] sm:$0xff]  ;;  %v269_v38 = vld [vmem:[#allocation6 + $0x58] sm:$0xff] }
  0x31   :  { %423 = vmatpush3.msra.mxu0 %v78_v9  ;;  %458 = vmatpush3.msra.mxu1 %v173_v14  ;;  %v268_v39 = vld [vmem:[#allocation6 + $0x50] sm:$0xff]  ;;  %v267_v40 = vld [vmem:[#allocation6 + $0x48] sm:$0xff]  ;;  %v266_v41 = vld [vmem:[#allocation6 + $0x40] sm:$0xff] }
  0x32   :  { %424 = vmatprep.subr.mxu0 %v593_v0  ;;  %459 = vmatprep.subr.mxu1 %v593_v0  ;;  %v265_v42 = vld [vmem:[#allocation6 + $0x38] sm:$0xff]  ;;  %v264_v43 = vld [vmem:[#allocation6 + $0x30] sm:$0xff]  ;;  %v263_v44 = vld [vmem:[#allocation6 + $0x28] sm:$0xff] }
  0x33   :  { %425 = vmatpush3.msra.mxu0 %v77_v11  ;;  %460 = vmatpush3.msra.mxu1 %v172_v16  ;;  %v262_v45 = vld [vmem:[#allocation6 + $0x20] sm:$0xff]  ;;  %v261_v52 = vld [vmem:[#allocation6 + $0x18] sm:$0xff]  ;;  %v260_v53 = vld [vmem:[#allocation6 + $0x10] sm:$0xff] }
  0x34   :  { %426 = vmatprep.subr.mxu0 %v593_v0  ;;  %461 = vmatprep.subr.mxu1 %v593_v0  ;;  %v358_v46 = vld [vmem:[%s717_s4] ss:$0 sm:$0xff]  ;;  %v259_v54 = vld [vmem:[#allocation6 + $0x8] sm:$0xff] }
  0x35   :  { %427 = vmatpush3.msra.mxu0 %v76_v13  ;;  %462 = vmatpush3.msra.mxu1 %v171_v18  ;;  %v258_v55 = vld [vmem:[#allocation6] sm:$0xff] }
  0x36   :  { %428 = vmatprep.subr.mxu0 %v593_v0  ;;  %463 = vmatprep.subr.mxu1 %v593_v0  ;;  %v359_v56 = vld [vmem:[%s718_s5] ss:$0 sm:$0xff] }
  0x37   :  { %429 = vmatpush3.msra.mxu0 %v75_v15  ;;  %464 = vmatpush3.msra.mxu1 %v170_v20  ;;  %v360_v62 = vld [vmem:[%s719_s6] ss:$0 sm:$0xff] }
  0x38   :  { %430 = vmatprep.subr.mxu0 %v593_v0  ;;  %465 = vmatprep.subr.mxu1 %v593_v0 }
  0x39   :  { %431 = vmatpush3.msra.mxu0 %v74_v17  ;;  %466 = vmatpush3.msra.mxu1 %v169_v22 }
  0x3a   :  { %432 = vmatprep.subr.mxu0 %v593_v0  ;;  %467 = vmatprep.subr.mxu1 %v593_v0 }
  0x3b   :  { %433 = vmatpush3.msra.mxu0 %v73_v19  ;;  %468 = vmatpush3.msra.mxu1 %v168_v24 }
  0x3c   :  { %434 = vmatprep.subr.mxu0 %v593_v0  ;;  %469 = vmatprep.subr.mxu1 %v593_v0 }
  0x3d   :  { %435 = vmatpush3.msra.mxu0 %v72_v21  ;;  %470 = vmatpush3.msra.mxu1 %v167_v26 }
  0x3e   :  { %436 = vmatprep.subr.mxu0 %v593_v0  ;;  %471 = vmatprep.subr.mxu1 %v593_v0 }
  0x3f   :  { %437 = vmatpush3.msra.mxu0 %v71_v23  ;;  %472 = vmatpush3.msra.mxu1 %v166_v30 }
  0x40   :  { %438 = vmatprep.subr.mxu0 %v593_v0  ;;  %473 = vmatprep.subr.mxu1 %v593_v0 }
  0x41   :  { %439 = vmatpush3.msra.mxu0 %v70_v25  ;;  %474 = vmatpush3.msra.mxu1 %v165_v31 }
  0x42   :  { %440 = vmatprep.subr.mxu0 %v593_v0  ;;  %475 = vmatprep.subr.mxu1 %v593_v0 }
  0x43   :  { %441 = vmatpush3.msra.mxu0 %v69_v27  ;;  %476 = vmatpush3.msra.mxu1 %v164_v32 }
  0x44   :  { %442 = vmatprep.subr.mxu0 %v593_v0  ;;  %477 = vmatprep.subr.mxu1 %v593_v0 }
  0x45   :  { %443 = vmatpush3.msra.mxu0 %v68_v28  ;;  %478 = vmatpush3.msra.mxu1 %v163_v33 }
  0x46   :  { %445 = vmatmul.mubr.f32.vlgmr.msra.gmra.mxu0 %v67_v29  ;;  %482 = vmatprep.subr.mxu0 %v593_v0 }
  0x47   :  { %514 = vmatprep.mubr.msk.f32.mxu0 %vm594_vm0, %v593_v0  ;;  %483 = vmatpush3.msra.mxu0 %v273_v34 }
  0x48   :  { %484 = vmatprep.subr.mxu0 %v593_v0 }
  0x49   :  { %485 = vmatpush3.msra.mxu0 %v272_v35 }
  0x4a   :  { %486 = vmatprep.subr.mxu0 %v593_v0 }
  0x4b   :  { %487 = vmatpush3.msra.mxu0 %v271_v36 }
  0x4c   :  { %488 = vmatprep.subr.mxu0 %v593_v0 }
  0x4d   :  { %489 = vmatpush3.msra.mxu0 %v270_v37 }
  0x4e   :  { %490 = vmatprep.subr.mxu0 %v593_v0 }
  0x4f   :  { %491 = vmatpush3.msra.mxu0 %v269_v38 }
  0x50   :  { %492 = vmatprep.subr.mxu0 %v593_v0 }
  0x51   :  { %493 = vmatpush3.msra.mxu0 %v268_v39 }
  0x52   :  { %494 = vmatprep.subr.mxu0 %v593_v0 }
  0x53   :  { %495 = vmatpush3.msra.mxu0 %v267_v40 }
  0x54   :  { %496 = vmatprep.subr.mxu0 %v593_v0 }
  0x55   :  { %497 = vmatpush3.msra.mxu0 %v266_v41 }
  0x56   :  { %498 = vmatprep.subr.mxu0 %v593_v0 }
  0x57   :  { %499 = vmatpush3.msra.mxu0 %v265_v42 }
  0x58   :  { %500 = vmatprep.subr.mxu0 %v593_v0 }
  0x59   :  { %501 = vmatpush3.msra.mxu0 %v264_v43 }
  0x5a   :  { %502 = vmatprep.subr.mxu0 %v593_v0 }
  0x5b   :  { %503 = vmatpush3.msra.mxu0 %v263_v44 }
  0x5c   :  { %504 = vmatprep.subr.mxu0 %v593_v0 }
  0x5d   :  { %505 = vmatpush3.msra.mxu0 %v262_v45 }
  0x5e   :  { %506 = vmatprep.subr.mxu0 %v593_v0 }
  0x5f   :  { %507 = vmatpush3.msra.mxu0 %v261_v52 }
  0x60   :  { %508 = vmatprep.subr.mxu0 %v593_v0 }
  0x61   :  { %509 = vmatpush3.msra.mxu0 %v260_v53 }
  0x62   :  { %510 = vmatprep.subr.mxu0 %v593_v0 }
  0x63   :  { %511 = vmatpush3.msra.mxu0 %v259_v54 }
  0x64   :  { %512 = vmatprep.subr.mxu0 %v593_v0 }
  0x65   :  { %513 = vmatpush3.msra.mxu0 %v258_v55 }
 0x106   :  { %v157_v47 = vpop.f32.mrf.mxu0 }
 0x107   :  { %v158_v48 = vadd.f32 %v358_v46, %v157_v47 }
 0x108   :  { %v446_v49 = vpop.f32.mrf.mxu0 }
 0x109   :  { %v161_v50 = vmul.f32 0.2, %v158_v48 }
 0x10b   :  { %v162_v51 = vmax.f32 %v158_v48, %v161_v50 }
 0x10d   :  { %480 = vmatmul.mubr.f32.vlgmr.msra.gmra.mxu1 %v162_v51 }
 0x1cd   :  { %v252_v57 = vpop.f32.mrf.mxu1 }
 0x1ce   :  { %v253_v58 = vadd.f32 %v359_v56, %v252_v57 }
 0x1cf   :  { %v481_v59 = vpop.f32.mrf.mxu1 }
 0x1d0   :  { %v256_v60 = vmul.f32 0.2, %v253_v58 }
 0x1d2   :  { %v257_v61 = vmax.f32 %v253_v58, %v256_v60 }
 0x1d4   :  { %515 = vmatmul.mubr.f32.vlgmr.msra.gmra.mxu0 %v257_v61 }
 0x294   :  { %v347_v63 = vpop.f32.mrf.mxu0 }
 0x295   :  { %v348_v1 = vadd.f32 %v360_v62, %v347_v63 }
 0x296   :  { %v516_v2 = vpop.f32.mrf.mxu0 }
 0x297   :  { %351 = vst [vmem:[%s720_s7] sm:$0xff] %v348_v1 }
 0x298   :  { %356 = vsyncpa [#allocation3], 1 }
 0x299   :  { %357 = vsyncpa [#allocation5], 1 }

</bundles_post_ra>
